<compile_context>
chip_gen: v6e
topology: v6e:2x2x1
jax: 0.10.0
libtpu: 0.0.40
codegen_flags: <defaults>
</compile_context>

<pallas_src>
import jax
import jax.numpy as jnp
import numpy as np
from jax.experimental import pallas as pl
from jax.experimental.pallas import tpu as pltpu


def _round_up(x, m):
    return ((x + m - 1) // m) * m


def _bilinear3_kernel(x1_ref, x2_ref, w1_ref, w1c_ref, w2_ref, w2c_ref,
                      sel_ref, o_ref):
    """One batch tile.  All widths are lane-aligned; no slicing needed."""
    # p[n, g*(in2+1)+j] = sum_i x1[n,i]*W[g,i,j] + B[g,j]   (j <  in2)
    #                   = sum_i x1[n,i]*A[g,i]  + bias[g]   (j == in2)
    p = jnp.dot(x1_ref[...], w1_ref[...],
                preferred_element_type=jnp.float32) + w1c_ref[...]
    # q[n, g*(in2+1)+j] = x2[n,j]  (j < in2) ;  1  (j == in2) ;  0 (padding)
    q = jnp.dot(x2_ref[...], w2_ref[...],
                preferred_element_type=jnp.float32) + w2c_ref[...]
    # Segment-sum each (in2+1)-wide group into its output channel on the MXU.
    acc = jnp.dot(p * q, sel_ref[...],
                  preferred_element_type=jnp.float32)          # (tb, out)
    # Lane-dense transposed store: (out, tb) with tb a lane multiple (or full).
    o_ref[...] = acc.T.astype(o_ref.dtype)


def _choose_tile(n, per_row_bytes):
    """Batch-tile size from an explicit VMEM budget; grid >= 2 when possible."""
    budget = 24 * 1024 * 1024          # conservative across v5e/v6e/v7x
    cap = max(128, (budget // per_row_bytes) // 128 * 128)
    if n <= 256:
        return n                       # single exact block (grid = 1)
    # >= 2 grid steps so the "parallel" axis can shard across v7x's 2 TCs.
    tb = min(2048, cap, _round_up(pl.cdiv(n, 2), 128))
    return max(tb, 128)


def bilinear3_forward(x1, x2, a_w, b_w, c_w, c_bias):
    """x1: (N, in1), x2: (N, in2); a_w: (out, in1), b_w: (out, in2),
    c_w: (out, in1, in2), c_bias: (out,).  Returns (N, out) float32."""
    n, in1 = x1.shape
    n2, in2 = x2.shape
    assert n == n2
    out_dim = a_w.shape[0]

    in2a = in2 + 1                       # +1 slot per group carries A/bias
    split = out_dim * in2a
    split_p = _round_up(split, 128)      # lane-aligned fused width
    pad = split_p - split

    x1 = x1.astype(jnp.float32)
    x2 = x2.astype(jnp.float32)
    a_w = a_w.astype(jnp.float32)
    b_w = b_w.astype(jnp.float32)
    c_w = c_w.astype(jnp.float32)
    c_bias = c_bias.astype(jnp.float32)

    # --- weight prep (tiny, wrapper-side) ------------------------------------
    # W1[i, g*in2a + j] = W[g,i,j] (j<in2) ; = A[g,i] (j==in2) ; 0 in padding.
    w_t = jnp.transpose(c_w, (1, 0, 2))                       # (in1, out, in2)
    w1 = jnp.concatenate([w_t, a_w.T[:, :, None]], axis=2)    # (in1, out, in2a)
    w1 = jnp.pad(w1.reshape(in1, split), ((0, 0), (0, pad)))  # (in1, split_p)
    # w1c[0, g*in2a + j] = B[g,j] (j<in2) ; = bias[g] (j==in2).
    w1c = jnp.concatenate([b_w, c_bias[:, None]], axis=1).reshape(1, split)
    w1c = jnp.pad(w1c, ((0, 0), (0, pad)))                    # (1, split_p)
    # W2[j', g*in2a + j] = (j'==j) for j<in2 ; 0 at the "+1" slot / padding.
    eye_blk = jnp.concatenate(
        [jnp.eye(in2, dtype=jnp.float32), jnp.zeros((in2, 1), jnp.float32)],
        axis=1)                                               # (in2, in2a)
    w2 = jnp.pad(jnp.tile(eye_blk, (1, out_dim)), ((0, 0), (0, pad)))
    # w2c[0, g*in2a + j] = 1 at j==in2 else 0 (the constant-1 slot).
    unit = jnp.zeros((in2a,), jnp.float32).at[in2].set(1.0)
    w2c = jnp.pad(jnp.tile(unit, (out_dim,))[None, :], ((0, 0), (0, pad)))
    # sel[k, g] = 1 iff column k belongs to output group g (padding rows 0).
    grp = jnp.arange(split) // in2a
    sel = (grp[:, None] == jnp.arange(out_dim)[None, :]).astype(jnp.float32)
    sel = jnp.pad(sel, ((0, pad), (0, 0)))                    # (split_p, out)

    # --- batch tiling from a VMEM budget -------------------------------------
    # Live bytes/row (f32): double-buffered inputs + p/q/p*q + (out, tb) tiles.
    per_row_bytes = 4 * (2 * (in1 + in2) + 3 * split_p + 3 * out_dim)
    const_bytes = 4 * split_p * (in1 + in2 + out_dim + 2)
    tb = _choose_tile(n, per_row_bytes)
    grid = pl.cdiv(n, tb)
    tile_bytes = tb * per_row_bytes + const_bytes
    vmem_limit = int(min(100 * 2**20, max(32 * 2**20, 2 * tile_bytes)))

    flops = n * (2 * split_p * (in1 + in2 + out_dim) + 3 * split_p)
    bytes_accessed = 4 * (n * (in1 + in2 + out_dim)
                          + split_p * (in1 + in2 + out_dim + 2))

    const = pl.Buffered(1)   # single-buffer grid-invariant operands
    out_t = pl.pallas_call(
        _bilinear3_kernel,
        out_shape=jax.ShapeDtypeStruct((out_dim, n), jnp.float32),
        grid_spec=pltpu.PrefetchScalarGridSpec(
            num_scalar_prefetch=0,
            grid=(grid,),
            in_specs=[
                pl.BlockSpec((tb, in1), lambda i: (i, 0)),
                pl.BlockSpec((tb, in2), lambda i: (i, 0)),
                pl.BlockSpec((in1, split_p), lambda i: (0, 0),
                             pipeline_mode=const),
                pl.BlockSpec((1, split_p), lambda i: (0, 0),
                             pipeline_mode=const),
                pl.BlockSpec((in2, split_p), lambda i: (0, 0),
                             pipeline_mode=const),
                pl.BlockSpec((1, split_p), lambda i: (0, 0),
                             pipeline_mode=const),
                pl.BlockSpec((split_p, out_dim), lambda i: (0, 0),
                             pipeline_mode=const),
            ],
            out_specs=pl.BlockSpec((out_dim, tb), lambda i: (0, i)),
        ),
        compiler_params=pltpu.CompilerParams(
            dimension_semantics=("parallel",),
            vmem_limit_bytes=vmem_limit,
        ),
        cost_estimate=pl.CostEstimate(
            flops=int(flops), transcendentals=0,
            bytes_accessed=int(bytes_accessed)),
    )(x1, x2, w1, w1c, w2, w2c, sel)

    # Undo the lane-dense transposed layout (tiny (out, N) array).
    return out_t.T


if __name__ == "__main__":
    # Small shapes consistent with the module: batch N, in1, in2, out.
    N, IN1, IN2, OUT = 16, 32, 16, 4
    key = jax.random.PRNGKey(0)
    k1, k2, ka, kb, kc, kbias = jax.random.split(key, 6)

    x1 = jax.random.normal(k1, (N, IN1), dtype=jnp.float32)
    x2 = jax.random.normal(k2, (N, IN2), dtype=jnp.float32)

    # PyTorch-default-style uniform init bounds.
    bound_a = 1.0 / np.sqrt(IN1)
    bound_b = 1.0 / np.sqrt(IN2)
    a_w = jax.random.uniform(ka, (OUT, IN1), jnp.float32, -bound_a, bound_a)
    b_w = jax.random.uniform(kb, (OUT, IN2), jnp.float32, -bound_b, bound_b)
    c_w = jax.random.uniform(kc, (OUT, IN1, IN2), jnp.float32, -bound_a, bound_a)
    c_bias = jax.random.uniform(kbias, (OUT,), jnp.float32, -bound_a, bound_a)

    out = jax.block_until_ready(bilinear3_forward(x1, x2, a_w, b_w, c_w, c_bias))
    out_np = np.asarray(out, dtype=np.float64)
    assert out_np.shape == (N, OUT)

    # Full-precision reference (f64 numpy) — kernel is f32 end-to-end, so a
    # tight tolerance checks strict parity with the PyTorch module semantics.
    x1f, x2f, a64, b64, c64 = (np.asarray(v, dtype=np.float64)
                               for v in (x1, x2, a_w, b_w, c_w))
    bias64 = np.asarray(c_bias, dtype=np.float64)
    ref = (x1f @ a64.T + x2f @ b64.T
           + np.einsum('ni,oij,nj->no', x1f, c64, x2f) + bias64[None, :])
    np.testing.assert_allclose(out_np, ref, rtol=1e-3, atol=1e-3)

    print("KERNEL_OK")
</pallas_src>

<mosaic_0001>
module attributes {stable_mosaic.version = 11 : i64} {
  func.func @_bilinear3_kernel(%arg0: i32, %arg1: memref<16x32xf32, #tpu.memory_space<vmem>>, %arg2: memref<16x16xf32, #tpu.memory_space<vmem>>, %arg3: memref<32x128xf32, #tpu.memory_space<vmem>>, %arg4: memref<1x128xf32, #tpu.memory_space<vmem>>, %arg5: memref<16x128xf32, #tpu.memory_space<vmem>>, %arg6: memref<1x128xf32, #tpu.memory_space<vmem>>, %arg7: memref<128x4xf32, #tpu.memory_space<vmem>>, %arg8: memref<4x16xf32, #tpu.memory_space<vmem>>) attributes {dimension_semantics = [#tpu.dimension_semantics<parallel>], iteration_bounds = array<i64: 1>, scalar_prefetch = 0 : i64, scratch_operands = 0 : i64, tpu.core_type = #tpu.core_type<tc>, window_params = [{transform_indices = @transform_0, window_bounds = array<i64: 16, 32>}, {transform_indices = @transform_1, window_bounds = array<i64: 16, 16>}, {pipeline_mode = #tpu.pipeline_mode<synchronous>, transform_indices = @transform_2, window_bounds = array<i64: 32, 128>}, {pipeline_mode = #tpu.pipeline_mode<synchronous>, transform_indices = @transform_3, window_bounds = array<i64: 1, 128>}, {pipeline_mode = #tpu.pipeline_mode<synchronous>, transform_indices = @transform_4, window_bounds = array<i64: 16, 128>}, {pipeline_mode = #tpu.pipeline_mode<synchronous>, transform_indices = @transform_5, window_bounds = array<i64: 1, 128>}, {pipeline_mode = #tpu.pipeline_mode<synchronous>, transform_indices = @transform_6, window_bounds = array<i64: 128, 4>}, {transform_indices = @transform_7, window_bounds = array<i64: 4, 16>}]} {
    %c0 = arith.constant 0 : index
    %c0_0 = arith.constant 0 : index
    %0 = vector.load %arg1[%c0, %c0_0] : memref<16x32xf32, #tpu.memory_space<vmem>>, vector<16x32xf32>
    %c0_1 = arith.constant 0 : index
    %c0_2 = arith.constant 0 : index
    %1 = vector.load %arg3[%c0_1, %c0_2] : memref<32x128xf32, #tpu.memory_space<vmem>>, vector<32x128xf32>
    %cst = arith.constant dense<0.000000e+00> : vector<16x128xf32>
    %2 = tpu.matmul %0, %1, %cst {dimension_numbers = #tpu.dot_dimension_numbers<[1], [0], [0], [1], [0, 0, 1, 1], [], []>} : vector<16x32xf32>, vector<32x128xf32>, vector<16x128xf32> -> vector<16x128xf32>
    %c0_3 = arith.constant 0 : index
    %c0_4 = arith.constant 0 : index
    %3 = vector.load %arg4[%c0_3, %c0_4] : memref<1x128xf32, #tpu.memory_space<vmem>>, vector<1x128xf32>
    %4 = vector.broadcast %3 : vector<1x128xf32> to vector<16x128xf32>
    %5 = arith.addf %2, %4 : vector<16x128xf32>
    %c0_5 = arith.constant 0 : index
    %c0_6 = arith.constant 0 : index
    %6 = vector.load %arg2[%c0_5, %c0_6] : memref<16x16xf32, #tpu.memory_space<vmem>>, vector<16x16xf32>
    %c0_7 = arith.constant 0 : index
    %c0_8 = arith.constant 0 : index
    %7 = vector.load %arg5[%c0_7, %c0_8] : memref<16x128xf32, #tpu.memory_space<vmem>>, vector<16x128xf32>
    %cst_9 = arith.constant dense<0.000000e+00> : vector<16x128xf32>
    %8 = tpu.matmul %6, %7, %cst_9 {dimension_numbers = #tpu.dot_dimension_numbers<[1], [0], [0], [1], [0, 0, 1, 1], [], []>} : vector<16x16xf32>, vector<16x128xf32>, vector<16x128xf32> -> vector<16x128xf32>
    %c0_10 = arith.constant 0 : index
    %c0_11 = arith.constant 0 : index
    %9 = vector.load %arg6[%c0_10, %c0_11] : memref<1x128xf32, #tpu.memory_space<vmem>>, vector<1x128xf32>
    %10 = vector.broadcast %9 : vector<1x128xf32> to vector<16x128xf32>
    %11 = arith.addf %8, %10 : vector<16x128xf32>
    %12 = arith.mulf %5, %11 : vector<16x128xf32>
    %c0_12 = arith.constant 0 : index
    %c0_13 = arith.constant 0 : index
    %13 = vector.load %arg7[%c0_12, %c0_13] : memref<128x4xf32, #tpu.memory_space<vmem>>, vector<128x4xf32>
    %cst_14 = arith.constant dense<0.000000e+00> : vector<16x4xf32>
    %14 = tpu.matmul %12, %13, %cst_14 {dimension_numbers = #tpu.dot_dimension_numbers<[1], [0], [0], [1], [0, 0, 1, 1], [], []>} : vector<16x128xf32>, vector<128x4xf32>, vector<16x4xf32> -> vector<16x4xf32>
    %15 = tpu.transpose %14, [1, 0] : vector<16x4xf32> -> vector<4x16xf32>
    %c0_15 = arith.constant 0 : index
    %c0_16 = arith.constant 0 : index
    %16 = vector.load %arg8[%c0_15, %c0_16] : memref<4x16xf32, #tpu.memory_space<vmem>>, vector<4x16xf32>
    tpu.vector_store %arg8[%c0_15, %c0_16], %15 {strides = array<i32>} : memref<4x16xf32, #tpu.memory_space<vmem>>, vector<4x16xf32>,
    return
  }
  func.func @transform_0(%arg0: i32) -> (i32, i32) {
    %c0_i32 = arith.constant 0 : i32
    %c0_i32_0 = arith.constant 0 : i32
    return %arg0, %c0_i32 : i32, i32
  }
  func.func @transform_1(%arg0: i32) -> (i32, i32) {
    %c0_i32 = arith.constant 0 : i32
    %c0_i32_0 = arith.constant 0 : i32
    return %arg0, %c0_i32 : i32, i32
  }
  func.func @transform_2(%arg0: i32) -> (i32, i32) {
    %c0_i32 = arith.constant 0 : i32
    %c0_i32_0 = arith.constant 0 : i32
    %c0_i32_1 = arith.constant 0 : i32
    return %c0_i32, %c0_i32_0 : i32, i32
  }
  func.func @transform_3(%arg0: i32) -> (i32, i32) {
    %c0_i32 = arith.constant 0 : i32
    %c0_i32_0 = arith.constant 0 : i32
    %c0_i32_1 = arith.constant 0 : i32
    return %c0_i32, %c0_i32_0 : i32, i32
  }
  func.func @transform_4(%arg0: i32) -> (i32, i32) {
    %c0_i32 = arith.constant 0 : i32
    %c0_i32_0 = arith.constant 0 : i32
    %c0_i32_1 = arith.constant 0 : i32
    return %c0_i32, %c0_i32_0 : i32, i32
  }
  func.func @transform_5(%arg0: i32) -> (i32, i32) {
    %c0_i32 = arith.constant 0 : i32
    %c0_i32_0 = arith.constant 0 : i32
    %c0_i32_1 = arith.constant 0 : i32
    return %c0_i32, %c0_i32_0 : i32, i32
  }
  func.func @transform_6(%arg0: i32) -> (i32, i32) {
    %c0_i32 = arith.constant 0 : i32
    %c0_i32_0 = arith.constant 0 : i32
    %c0_i32_1 = arith.constant 0 : i32
    return %c0_i32, %c0_i32_0 : i32, i32
  }
  func.func @transform_7(%arg0: i32) -> (i32, i32) {
    %c0_i32 = arith.constant 0 : i32
    %c0_i32_0 = arith.constant 0 : i32
    return %c0_i32, %arg0 : i32, i32
  }
}

</mosaic_0001>

<bundles_post_ra>
// kernel: tpu_custom_call.1
= control target key start
LH: loop header
LB: loop body
LE: loop exit
PB: predicated region body
PF: predicated region fallthrough
CT: control target
= control target key end

     0   :  { %vm40_vm0 = vcmask 261120   ;;  %s599_s0 = inlined_call_operand.vmem [shape: f32[16,32], index: 0, kind: input, shape index: {}]   ;;  %s600_s1 = inlined_call_operand.vmem [shape: f32[16,16], index: 1, kind: input, shape index: {}]   ;;  %s601_s2 = inlined_call_operand.vmem [shape: f32[32,128], index: 2, kind: input, shape index: {}]   ;;  %s602_s3 = inlined_call_operand.vmem [shape: f32[1,128], index: 3, kind: input, shape index: {}]   ;;  %s603_s4 = inlined_call_operand.vmem [shape: f32[16,128], index: 4, kind: input, shape index: {}]   ;;  %s604_s5 = inlined_call_operand.vmem [shape: f32[1,128], index: 5, kind: input, shape index: {}]   ;;  %s605_s6 = inlined_call_operand.vmem [shape: f32[128,4], index: 6, kind: input, shape index: {}]   ;;  %s606_s7 = inlined_call_operand.hbm [shape: f32[4,16], index: 7, kind: output, shape index: {}]  }
   0x1   :  { %v32_v0 = vld [vmem:[%s601_s2 + $0x18] sm:$0xff]  ;;  %v31_v1 = vld [vmem:[%s601_s2 + $0x10] sm:$0xff]  ;;  %v27_v2 = vld [vmem:[%s599_s0] sm:$0xff] }
   0x2   :  { %390 = vmatprep.subr.mxu0 %v32_v0  ;;  %v30_v3 = vld [vmem:[%s601_s2 + $0x8] sm:$0xff]  ;;  %398 = vmatprep.mubr.msk.f32.mxu0 %vm40_vm0, %v27_v2  ;;  %v232_v4 = vld [vmem:[%s605_s6 + $0x78] sm:$0xff]  ;;  %v231_v5 = vld [vmem:[%s605_s6 + $0x70] sm:$0xff] }
   0x3   :  { %391 = vmatpush3.msra.mxu0 %v32_v0  ;;  %v29_v6 = vld [vmem:[%s601_s2] sm:$0xff]  ;;  %408 = vmatprep.subr.mxu1 %v232_v4  ;;  %v230_v7 = vld [vmem:[%s605_s6 + $0x68] sm:$0xff] }
   0x4   :  { %392 = vmatprep.subr.mxu0 %v31_v1  ;;  %409 = vmatpush3.msra.mxu1 %v232_v4  ;;  %v28_v8 = vld [vmem:[%s599_s0 + $0x8] sm:$0xff] }
   0x5   :  { %393 = vmatpush3.msra.mxu0 %v31_v1  ;;  %v125_v9 = vld [vmem:[%s603_s4 + $0x8] sm:$0xff]  ;;  %410 = vmatprep.subr.mxu1 %v231_v5 }
   0x6   :  { %394 = vmatprep.subr.mxu0 %v30_v3 }
   0x7   :  { %395 = vmatpush3.msra.mxu0 %v30_v3 }
   0x8   :  { %12 = vsyncpa [#allocation3], 0  ;;  %396 = vmatprep.subr.mxu0 %v29_v6  ;;  %v122_v10 = vld [vmem:[%s600_s1] sm:$0xff]  ;;  %vm133_vm1 = vcmask 130048   ;;  %411 = vmatpush3.msra.mxu1 %v231_v5  ;;  %v123_v13 = vld [vmem:[%s600_s1 + $0x8] sm:$0xff]  ;;  %vm340_vm2 = vcmask 125952  }
   0x9   :  { %397 = vmatpush3.msra.mxu0 %v29_v6  ;;  %v124_v11 = vld [vmem:[%s603_s4] sm:$0xff]  ;;  %412 = vmatprep.subr.mxu1 %v230_v7  ;;  %v228_v14 = vld [vmem:[%s605_s6 + $0x58] sm:$0xff]  ;;  %v227_v15 = vld [vmem:[%s605_s6 + $0x50] sm:$0xff] }
   0xa   :  { %399 = vmatmul.mubr.msk.f32.vlgmr.msra.gmra.mxu0 %vm40_vm0, %v28_v8  ;;  %401 = vmatprep.subr.mxu0 %v125_v9  ;;  %v229_v12 = vld [vmem:[%s605_s6 + $0x60] sm:$0xff]  ;;  %v226_v16 = vld [vmem:[%s605_s6 + $0x48] sm:$0xff]  ;;  %v224_v18 = vld [vmem:[%s605_s6 + $0x38] sm:$0xff] }
   0xb   :  { %402 = vmatpush3.msra.mxu0 %v125_v9  ;;  %405 = vmatprep.mubr.msk.f32.mxu0 %vm133_vm1, %v122_v10  ;;  %v225_v17 = vld [vmem:[%s605_s6 + $0x40] sm:$0xff]  ;;  %v223_v19 = vld [vmem:[%s605_s6 + $0x30] sm:$0xff]  ;;  %v222_v20 = vld [vmem:[%s605_s6 + $0x28] sm:$0xff] }
   0xc   :  { %403 = vmatprep.subr.mxu0 %v124_v11  ;;  %413 = vmatpush3.msra.mxu1 %v230_v7  ;;  %v221_v21 = vld [vmem:[%s605_s6 + $0x20] sm:$0xff]  ;;  %v220_v22 = vld [vmem:[%s605_s6 + $0x18] sm:$0xff]  ;;  %v219_v23 = vld [vmem:[%s605_s6 + $0x10] sm:$0xff] }
   0xd   :  { %404 = vmatpush3.msra.mxu0 %v124_v11  ;;  %414 = vmatprep.subr.mxu1 %v229_v12  ;;  %v218_v24 = vld [vmem:[%s605_s6 + $0x8] sm:$0xff]  ;;  %v217_v25 = vld [vmem:[%s605_s6] sm:$0xff]  ;;  %s467_s6 = smov [#allocation2]  }
   0xe   :  { %406 = vmatmul.mubr.msk.f32.vlgmr.msra.gmra.mxu0 %vm133_vm1, %v123_v13  ;;  %415 = vmatpush3.msra.mxu1 %v229_v12  ;;  %v359_v28 = vld [vmem:[%s604_s5] ss:$0 sm:$0xff]  ;;  %s348_s5 = sshll.u32 %s467_s6, 4  ;;  %s349_s5 = int_to_ptr.vmem [resolvable:$true] %s348_s5 }
   0xf   :  { %416 = vmatprep.subr.mxu1 %v228_v14  ;;  %v356_v30 = vld [vmem:[%s602_s3] ss:$0 sm:$0xff]  ;;  %s445_s3 = scalar_lea.vmem %s349_s5, 64  ;;  %p450_p1 = scmp.lt.s32.totalorder %s349_s5, %s349_s5 }
  0x10   :  { %417 = vmatpush3.msra.mxu1 %v228_v14  ;;  %p446_p0 = scmp.ne.s32.totalorder %s349_s5, %s445_s3  ;;  %p451_p2 = scmp.lt.s32.totalorder %s445_s3, %s445_s3 }
  0x11   :  { %418 = vmatprep.subr.mxu1 %v227_v15 }
  0x12   :  { %419 = vmatpush3.msra.mxu1 %v227_v15  ;;  %p452_p3 = por %p451_p2, %p450_p1 }
  0x13   :  { %420 = vmatprep.subr.mxu1 %v226_v16 }
  0x14   :  { %421 = vmatpush3.msra.mxu1 %v226_v16  ;;  %p453_p4 = pnand %p452_p3, %p446_p0 }
  0x15   :  { %422 = vmatprep.subr.mxu1 %v225_v17 }
  0x16   :  { %423 = vmatpush3.msra.mxu1 %v225_v17 }
  0x17   :  { %424 = vmatprep.subr.mxu1 %v224_v18 }
  0x18   :  { %425 = vmatpush3.msra.mxu1 %v224_v18 }
  0x19   :  { %426 = vmatprep.subr.mxu1 %v223_v19 }
  0x1a   :  { %427 = vmatpush3.msra.mxu1 %v223_v19 }
  0x1b   :  { %428 = vmatprep.subr.mxu1 %v222_v20 }
  0x1c   :  { %429 = vmatpush3.msra.mxu1 %v222_v20 }
  0x1d   :  { %430 = vmatprep.subr.mxu1 %v221_v21 }
  0x1e   :  { %431 = vmatpush3.msra.mxu1 %v221_v21 }
  0x1f   :  { %432 = vmatprep.subr.mxu1 %v220_v22 }
  0x20   :  { %433 = vmatpush3.msra.mxu1 %v220_v22 }
  0x21   :  { %434 = vmatprep.subr.mxu1 %v219_v23 }
  0x22   :  { %435 = vmatpush3.msra.mxu1 %v219_v23 }
  0x23   :  { %436 = vmatprep.subr.mxu1 %v218_v24 }
  0x24   :  { %437 = vmatpush3.msra.mxu1 %v218_v24 }
  0x25   :  { %438 = vmatprep.subr.mxu1 %v217_v25 }
  0x26   :  { %439 = vmatpush3.msra.mxu1 %v217_v25 }
  0xca   :  { %v400_v26 = vpop.f32.mrf.mxu0 }
  0xcb   :  { %v119_v35 = vadd.f32 %v400_v26, %v356_v30 }
  0xcc   :  { %v113_v27 = vpop.f32.mrf.mxu0 }
  0xcd   :  { %v114_v33 = vadd.f32 %v356_v30, %v113_v27 }
  0xce   :  { %v407_v29 = vpop.f32.mrf.mxu0 }
  0xcf   :  { %v212_v31 = vadd.f32 %v407_v29, %v359_v28 }
  0xd0   :  { %v206_v32 = vpop.f32.mrf.mxu0 }
  0xd1   :  { %v207_v34 = vadd.f32 %v359_v28, %v206_v32  ;;  %v216_v37 = vmul.f32 %v212_v31, %v119_v35 }
  0xd3   :  { %v215_v36 = vmul.f32 %v207_v34, %v114_v33 }
  0xd5   :  { %440 = vmatprep.mubr.f32.mxu1 %v215_v36 }
  0xd6   :  { %441 = vmatmul.mubr.f32.vlgmr.msra.gmra.mxu1 %v216_v37 }
 0x196   :  { %v442_v38 = vpop.f32.mrf.mxu1 }
 0x198   :  { %v299_v39 = vpop.f32.mrf.mxu1 }
 0x199   :  { %308 = vxpose.xlu0.b32.start [1/2] (short) (narrow) %v299_v39, 8 }
 0x19d   :  { %309 = vxpose.xlu0.b32.end [2/2] (short) (narrow) %v442_v38, 8 }
 0x215   :  { %v324_v40 = vpop.trf.xlu0 }
 0x216   :  { %341 = vst.msk [vmem:[#allocation2] sm:$0xf] %vm340_vm2, %v324_v40 }
 0x217   :  { %456 = shalt.err (!%p453_p4)
}
 0x218   :  { %351 = dma.vmem_to_hbm [thread:$0]  %s349_s5, 64, %s606_s7, [#allocation3]  }
 0x219   :  { %465 = dma.done.wait [#allocation3], 64  }
 0x21a   :  { %466 = vsyncadd [#allocation3], 4294967232 }
 0x21b   :  { %355 = vsyncpa [#allocation3], 1 }

</bundles_post_ra>
